<compile_context>
chip_gen: v7x
topology: tpu7x:2x2x1
jax: 0.10.0
libtpu: 0.0.40
codegen_flags: <defaults>
</compile_context>

<pallas_src>
import functools

import jax
import jax.numpy as jnp
from jax.experimental import pallas as pl
from jax.experimental.pallas import tpu as pltpu


# ----------------------------- Pallas kernel -----------------------------

def _attflat_kernel(x_ref, w1_ref, b1_ref, w2_ref, b2_ref, wm_ref, bm_ref, o_ref,
                    *, glimpses, hsize):
    # x_ref block: (1, N, HSIZE) for the current batch element.
    x = x_ref[0]                                                     # (N, HSIZE)

    # MLP: FC(HSIZE -> MID) + ReLU, then Linear(MID -> G). Fully fused, f32 accum.
    h = jnp.dot(x, w1_ref[...], preferred_element_type=jnp.float32)
    h = jnp.maximum(h + b1_ref[...], 0.0)                            # (N, MID)
    logits = jnp.dot(h.astype(w2_ref.dtype), w2_ref[...],
                     preferred_element_type=jnp.float32)
    logits = logits + b2_ref[...]                                    # (N, G)

    # Softmax over the token axis (PyTorch dim=1 == axis 0 of this per-batch tile).
    m = jnp.max(logits, axis=0, keepdims=True)
    p = jnp.exp(logits - m)
    att = p / jnp.sum(p, axis=0, keepdims=True)                      # (N, G)

    # Glimpse pooling: x_atted[g, :] = sum_n att[n, g] * x[n, :]
    # dot_general contracting the token dim of both operands -> MXU, no transpose.
    xa = jax.lax.dot_general(att.astype(x.dtype), x,
                             (((0,), (0,)), ((), ())),
                             preferred_element_type=jnp.float32)     # (G, HSIZE)

    # linear_merge fused in: out = concat_g(xa[g]) @ wm + bm.
    # Static loop over glimpses with row-slices of wm avoids reshuffling
    # (G, HSIZE) -> (1, G*HSIZE) across lanes.
    acc = bm_ref[...].astype(jnp.float32)                            # (1, OUT)
    for g in range(glimpses):
        acc = acc + jnp.dot(xa[g:g + 1, :].astype(wm_ref.dtype),
                            wm_ref[g * hsize:(g + 1) * hsize, :],
                            preferred_element_type=jnp.float32)
    o_ref[0] = acc.astype(o_ref.dtype)                               # (1, OUT), lane-dense


# ----------------------------- wrapper -----------------------------

def attflat_pallas(x, params, *, glimpses):
    """x: (B, N, HSIZE); params weights stored as (in, out) (PyTorch weight.T)."""
    B, N, HSIZE = x.shape
    MID = params["w1"].shape[1]
    OUT = params["wm"].shape[1]
    assert params["w2"].shape == (MID, glimpses)
    assert params["wm"].shape[0] == glimpses * HSIZE

    b1 = params["b1"].reshape(1, MID).astype(x.dtype)
    b2 = params["b2"].reshape(1, glimpses).astype(x.dtype)
    bm = params["bm"].reshape(1, OUT).astype(x.dtype)

    out = pl.pallas_call(
        functools.partial(_attflat_kernel, glimpses=glimpses, hsize=HSIZE),
        out_shape=jax.ShapeDtypeStruct((B, 1, OUT), x.dtype),
        grid_spec=pltpu.PrefetchScalarGridSpec(
            num_scalar_prefetch=0,
            grid=(B,),
            in_specs=[
                pl.BlockSpec((1, N, HSIZE), lambda b: (b, 0, 0)),          # streams per batch
                pl.BlockSpec((HSIZE, MID), lambda b: (0, 0)),              # resident weights
                pl.BlockSpec((1, MID), lambda b: (0, 0)),
                pl.BlockSpec((MID, glimpses), lambda b: (0, 0)),
                pl.BlockSpec((1, glimpses), lambda b: (0, 0)),
                pl.BlockSpec((glimpses * HSIZE, OUT), lambda b: (0, 0)),
                pl.BlockSpec((1, OUT), lambda b: (0, 0)),
            ],
            out_specs=pl.BlockSpec((1, 1, OUT), lambda b: (b, 0, 0)),
        ),
        compiler_params=pltpu.CompilerParams(
            dimension_semantics=("parallel",)),                            # shards over 2 TCs on v7x
    )(x, params["w1"], b1, params["w2"], b2, params["wm"], bm)
    return out.reshape(B, OUT)


# ----------------------------- pure-JAX reference -----------------------------

def attflat_reference(x, params, *, glimpses):
    h = jnp.maximum(x @ params["w1"] + params["b1"], 0.0)
    att = h @ params["w2"] + params["b2"]                 # (B, N, G)
    att = jax.nn.softmax(att, axis=1)                     # softmax over tokens
    att_list = [jnp.sum(att[:, :, i:i + 1] * x, axis=1) for i in range(glimpses)]
    x_atted = jnp.concatenate(att_list, axis=1)           # (B, G*HSIZE)
    return x_atted @ params["wm"] + params["bm"]          # (B, OUT)


# ----------------------------- main -----------------------------

if __name__ == "__main__":
    # Small config consistent with the module: HSIZE channels per token, MLP mid
    # size, G glimpses, OUT merge size (kept lane-friendly multiples of 128).
    B, N = 2, 16
    HSIZE = 128
    MLP_SIZE = 256
    GLIMPSES = 2
    OUT_SIZE = 256

    key = jax.random.PRNGKey(0)
    ks = jax.random.split(key, 8)
    scale = 0.05
    params = {
        # weights stored as (in, out)  (== PyTorch Linear weight transposed)
        "w1": scale * jax.random.normal(ks[0], (HSIZE, MLP_SIZE), jnp.float32),
        "b1": scale * jax.random.normal(ks[1], (MLP_SIZE,), jnp.float32),
        "w2": scale * jax.random.normal(ks[2], (MLP_SIZE, GLIMPSES), jnp.float32),
        "b2": scale * jax.random.normal(ks[3], (GLIMPSES,), jnp.float32),
        "wm": scale * jax.random.normal(ks[4], (GLIMPSES * HSIZE, OUT_SIZE), jnp.float32),
        "bm": scale * jax.random.normal(ks[5], (OUT_SIZE,), jnp.float32),
    }
    x = jax.random.normal(ks[6], (B, N, HSIZE), jnp.float32)

    out = attflat_pallas(x, params, glimpses=GLIMPSES)
    out = jax.block_until_ready(out)

    ref = attflat_reference(x, params, glimpses=GLIMPSES)
    assert out.shape == (B, OUT_SIZE)
    assert jnp.allclose(out, ref, atol=1e-4, rtol=1e-4), float(jnp.max(jnp.abs(out - ref)))

    print("KERNEL_OK")
</pallas_src>

<mosaic_0001>
module attributes {stable_mosaic.version = 11 : i64} {
  func.func @_attflat_kernel(%arg0: i32, %arg1: memref<1x16x128xf32, #tpu.memory_space<vmem>>, %arg2: memref<128x256xf32, #tpu.memory_space<vmem>>, %arg3: memref<1x256xf32, #tpu.memory_space<vmem>>, %arg4: memref<256x2xf32, #tpu.memory_space<vmem>>, %arg5: memref<1x2xf32, #tpu.memory_space<vmem>>, %arg6: memref<256x256xf32, #tpu.memory_space<vmem>>, %arg7: memref<1x256xf32, #tpu.memory_space<vmem>>, %arg8: memref<1x1x256xf32, #tpu.memory_space<vmem>>) attributes {dimension_semantics = [#tpu.dimension_semantics<parallel>], iteration_bounds = array<i64: 2>, scalar_prefetch = 0 : i64, scratch_operands = 0 : i64, tpu.core_type = #tpu.core_type<tc>, window_params = [{transform_indices = @transform_0, window_bounds = array<i64: 1, 16, 128>}, {pipeline_mode = #tpu.pipeline_mode<synchronous>, transform_indices = @transform_1, window_bounds = array<i64: 128, 256>}, {pipeline_mode = #tpu.pipeline_mode<synchronous>, transform_indices = @transform_2, window_bounds = array<i64: 1, 256>}, {pipeline_mode = #tpu.pipeline_mode<synchronous>, transform_indices = @transform_3, window_bounds = array<i64: 256, 2>}, {pipeline_mode = #tpu.pipeline_mode<synchronous>, transform_indices = @transform_4, window_bounds = array<i64: 1, 2>}, {pipeline_mode = #tpu.pipeline_mode<synchronous>, transform_indices = @transform_5, window_bounds = array<i64: 256, 256>}, {pipeline_mode = #tpu.pipeline_mode<synchronous>, transform_indices = @transform_6, window_bounds = array<i64: 1, 256>}, {transform_indices = @transform_7, window_bounds = array<i64: 1, 1, 256>}]} {
    %c0 = arith.constant 0 : index
    %c0_0 = arith.constant 0 : index
    %c0_1 = arith.constant 0 : index
    %0 = vector.load %arg1[%c0, %c0_0, %c0_1] : memref<1x16x128xf32, #tpu.memory_space<vmem>>, vector<1x16x128xf32>
    %1 = vector.shape_cast %0 : vector<1x16x128xf32> to vector<16x128xf32>
    %c0_2 = arith.constant 0 : index
    %c0_3 = arith.constant 0 : index
    %2 = vector.load %arg2[%c0_2, %c0_3] : memref<128x256xf32, #tpu.memory_space<vmem>>, vector<128x256xf32>
    %cst = arith.constant dense<0.000000e+00> : vector<16x256xf32>
    %3 = tpu.matmul %1, %2, %cst {dimension_numbers = #tpu.dot_dimension_numbers<[1], [0], [0], [1], [0, 0, 1, 1], [], []>} : vector<16x128xf32>, vector<128x256xf32>, vector<16x256xf32> -> vector<16x256xf32>
    %c0_4 = arith.constant 0 : index
    %c0_5 = arith.constant 0 : index
    %4 = vector.load %arg3[%c0_4, %c0_5] : memref<1x256xf32, #tpu.memory_space<vmem>>, vector<1x256xf32>
    %5 = vector.broadcast %4 : vector<1x256xf32> to vector<16x256xf32>
    %6 = arith.addf %3, %5 : vector<16x256xf32>
    %cst_6 = arith.constant 0.000000e+00 : f32
    %7 = vector.broadcast %cst_6 : f32 to vector<16x256xf32>
    %8 = arith.maximumf %6, %7 : vector<16x256xf32>
    %c0_7 = arith.constant 0 : index
    %c0_8 = arith.constant 0 : index
    %9 = vector.load %arg4[%c0_7, %c0_8] : memref<256x2xf32, #tpu.memory_space<vmem>>, vector<256x2xf32>
    %cst_9 = arith.constant dense<0.000000e+00> : vector<16x2xf32>
    %10 = tpu.matmul %8, %9, %cst_9 {dimension_numbers = #tpu.dot_dimension_numbers<[1], [0], [0], [1], [0, 0, 1, 1], [], []>} : vector<16x256xf32>, vector<256x2xf32>, vector<16x2xf32> -> vector<16x2xf32>
    %c0_10 = arith.constant 0 : index
    %c0_11 = arith.constant 0 : index
    %11 = vector.load %arg5[%c0_10, %c0_11] : memref<1x2xf32, #tpu.memory_space<vmem>>, vector<1x2xf32>
    %12 = vector.broadcast %11 : vector<1x2xf32> to vector<16x2xf32>
    %13 = arith.addf %10, %12 : vector<16x2xf32>
    %cst_12 = arith.constant dense<0xFF800000> : vector<2xf32>
    %14 = vector.multi_reduction <maximumf>, %13, %cst_12 [0] : vector<16x2xf32> to vector<2xf32>
    %15 = vector.shape_cast %14 : vector<2xf32> to vector<1x2xf32>
    %16 = vector.broadcast %15 : vector<1x2xf32> to vector<16x2xf32>
    %17 = arith.subf %13, %16 : vector<16x2xf32>
    %18 = math.exp %17 : vector<16x2xf32>
    %cst_13 = arith.constant dense<0.000000e+00> : vector<2xf32>
    %19 = vector.multi_reduction <add>, %18, %cst_13 [0] : vector<16x2xf32> to vector<2xf32>
    %20 = vector.shape_cast %19 : vector<2xf32> to vector<1x2xf32>
    %21 = vector.broadcast %20 : vector<1x2xf32> to vector<16x2xf32>
    %22 = arith.divf %18, %21 : vector<16x2xf32>
    %cst_14 = arith.constant dense<0.000000e+00> : vector<2x128xf32>
    %23 = tpu.matmul %22, %1, %cst_14 {dimension_numbers = #tpu.dot_dimension_numbers<[0], [0], [1], [1], [0, 1, 1, 1], [], []>} : vector<16x2xf32>, vector<16x128xf32>, vector<2x128xf32> -> vector<2x128xf32>
    %c0_15 = arith.constant 0 : index
    %c0_16 = arith.constant 0 : index
    %24 = vector.load %arg7[%c0_15, %c0_16] : memref<1x256xf32, #tpu.memory_space<vmem>>, vector<1x256xf32>
    %25 = vector.extract_strided_slice %23 {offsets = [0, 0], sizes = [1, 128], strides = [1, 1]} : vector<2x128xf32> to vector<1x128xf32>
    %c0_17 = arith.constant 0 : index
    %c0_18 = arith.constant 0 : index
    %26 = vector.load %arg6[%c0_17, %c0_18] : memref<256x256xf32, #tpu.memory_space<vmem>>, vector<128x256xf32>
    %cst_19 = arith.constant dense<0.000000e+00> : vector<1x256xf32>
    %27 = tpu.matmul %25, %26, %cst_19 {dimension_numbers = #tpu.dot_dimension_numbers<[1], [0], [0], [1], [0, 0, 1, 1], [], []>} : vector<1x128xf32>, vector<128x256xf32>, vector<1x256xf32> -> vector<1x256xf32>
    %28 = arith.addf %24, %27 : vector<1x256xf32>
    %29 = vector.extract_strided_slice %23 {offsets = [1, 0], sizes = [1, 128], strides = [1, 1]} : vector<2x128xf32> to vector<1x128xf32>
    %c128 = arith.constant 128 : index
    %c0_20 = arith.constant 0 : index
    %30 = vector.load %arg6[%c128, %c0_20] : memref<256x256xf32, #tpu.memory_space<vmem>>, vector<128x256xf32>
    %cst_21 = arith.constant dense<0.000000e+00> : vector<1x256xf32>
    %31 = tpu.matmul %29, %30, %cst_21 {dimension_numbers = #tpu.dot_dimension_numbers<[1], [0], [0], [1], [0, 0, 1, 1], [], []>} : vector<1x128xf32>, vector<128x256xf32>, vector<1x256xf32> -> vector<1x256xf32>
    %32 = arith.addf %28, %31 : vector<1x256xf32>
    %c0_22 = arith.constant 0 : index
    %c0_23 = arith.constant 0 : index
    %c0_24 = arith.constant 0 : index
    %33 = vector.load %arg8[%c0_22, %c0_23, %c0_24] : memref<1x1x256xf32, #tpu.memory_space<vmem>>, vector<1x1x256xf32>
    %34 = vector.shape_cast %33 : vector<1x1x256xf32> to vector<1x256xf32>
    %35 = vector.shape_cast %32 : vector<1x256xf32> to vector<1x1x256xf32>
    tpu.vector_store %arg8[%c0_22, %c0_23, %c0_24], %35 {strides = array<i32>} : memref<1x1x256xf32, #tpu.memory_space<vmem>>, vector<1x1x256xf32>,
    return
  }
  func.func @transform_0(%arg0: i32) -> (i32, i32, i32) {
    %c0_i32 = arith.constant 0 : i32
    %c0_i32_0 = arith.constant 0 : i32
    %c0_i32_1 = arith.constant 0 : i32
    return %arg0, %c0_i32, %c0_i32_0 : i32, i32, i32
  }
  func.func @transform_1(%arg0: i32) -> (i32, i32) {
    %c0_i32 = arith.constant 0 : i32
    %c0_i32_0 = arith.constant 0 : i32
    %c0_i32_1 = arith.constant 0 : i32
    return %c0_i32, %c0_i32_0 : i32, i32
  }
  func.func @transform_2(%arg0: i32) -> (i32, i32) {
    %c0_i32 = arith.constant 0 : i32
    %c0_i32_0 = arith.constant 0 : i32
    %c0_i32_1 = arith.constant 0 : i32
    return %c0_i32, %c0_i32_0 : i32, i32
  }
  func.func @transform_3(%arg0: i32) -> (i32, i32) {
    %c0_i32 = arith.constant 0 : i32
    %c0_i32_0 = arith.constant 0 : i32
    %c0_i32_1 = arith.constant 0 : i32
    return %c0_i32, %c0_i32_0 : i32, i32
  }
  func.func @transform_4(%arg0: i32) -> (i32, i32) {
    %c0_i32 = arith.constant 0 : i32
    %c0_i32_0 = arith.constant 0 : i32
    %c0_i32_1 = arith.constant 0 : i32
    return %c0_i32, %c0_i32_0 : i32, i32
  }
  func.func @transform_5(%arg0: i32) -> (i32, i32) {
    %c0_i32 = arith.constant 0 : i32
    %c0_i32_0 = arith.constant 0 : i32
    %c0_i32_1 = arith.constant 0 : i32
    return %c0_i32, %c0_i32_0 : i32, i32
  }
  func.func @transform_6(%arg0: i32) -> (i32, i32) {
    %c0_i32 = arith.constant 0 : i32
    %c0_i32_0 = arith.constant 0 : i32
    %c0_i32_1 = arith.constant 0 : i32
    return %c0_i32, %c0_i32_0 : i32, i32
  }
  func.func @transform_7(%arg0: i32) -> (i32, i32, i32) {
    %c0_i32 = arith.constant 0 : i32
    %c0_i32_0 = arith.constant 0 : i32
    %c0_i32_1 = arith.constant 0 : i32
    return %arg0, %c0_i32, %c0_i32_0 : i32, i32, i32
  }
}

</mosaic_0001>

<bundles_post_ra>
// kernel: tpu_custom_call.1
= control target key start
LH: loop header
LB: loop body
LE: loop exit
PB: predicated region body
PF: predicated region fallthrough
CT: control target
= control target key end

     0   :  { %12 = vsyncpa [#allocation3], 0  ;;  %s1918_s0 = inlined_call_operand.hbm [shape: f32[2,16,128], index: 0, kind: input, shape index: {}]   ;;  %s1919_s1 = inlined_call_operand.vmem [shape: f32[128,256], index: 1, kind: input, shape index: {}]   ;;  %s1920_s2 = inlined_call_operand.vmem [shape: f32[1,256], index: 2, kind: input, shape index: {}]   ;;  %s1921_s3 = inlined_call_operand.vmem [shape: f32[256,2], index: 3, kind: input, shape index: {}]   ;;  %s1922_s4 = inlined_call_operand.vmem [shape: f32[1,2], index: 4, kind: input, shape index: {}]   ;;  %s1923_s5 = inlined_call_operand.hbm [shape: f32[256,256], index: 5, kind: input, shape index: {}]   ;;  %s1924_s6 = inlined_call_operand.vmem [shape: f32[1,256], index: 6, kind: input, shape index: {}]   ;;  %s1925_s7 = inlined_call_operand.hbm [shape: f32[2,1,256], index: 7, kind: output, shape index: {}]  }
   0x1   :  { %14 = vsyncpa [#allocation3 + $0x1], 0 }
   0x2   :  { %15 = vsyncpa [#allocation6], 0 }
   0x3   :  { %16 = vsyncpa [#allocation4], 0 }
   0x4   :  { %18 = vsyncpa [#allocation4 + $0x1], 0  ;;  %s1486_s24 = smov 0   ;;  %s1488_s25 = smov 0  }
   0x5   :  { %s1490_s26 = smov 0   ;;  %s1492_s27 = smov 0  }
   0x6 LB: > { %s1507_s28 = sadd.s32 4294967295, %s1433_s27   ;;  %s1035_s29 = sadd.s32 4294967294, %s1433_s27   ;;  %s1433_s27 = sphi %s1492_s27, %s1945_s27   ;;  %s1429_s26 = sphi %s1490_s26, %s1944_s26   ;;  %s1425_s25 = sphi %s1488_s25, %s1943_s25   ;;  %s1421_s24 = sphi %s1486_s24, %s1942_s24  }
   0x7   : > { %p44_p0 = scmp.ne.s32.totalorder %s1425_s25, %s1421_s24  ;;  %p1926_p1 = scmp.eq.s32.totalorder %s1507_s28, 0 }
   0x8   : > { %p200_p3 = scmp.eq.s32.totalorder %s1035_s29, 1  ;;  %p1036_p5 = scmp.ge.s32.totalorder %s1433_s27, 1 }
   0x9   : > { %p1516_p4 = por %p1926_p1, %p44_p0  ;;  %p207_p7 = scmp.lt.s32.totalorder %s1433_s27, 3 }
   0xa   : > { %p1521_p6 = por %p200_p3, %p44_p0  ;;  %s1435_s10 = smov [#allocation5]  }
   0xb   : > { %s1929_s30 = scalar_select %p1516_p4, 1, 0 }
   0xc   : > { %s1930_s8 = scalar_select %p1521_p6, 1, 0 }
   0xd   : > { %p1526_p8 = pnand %p1036_p5, %p207_p7  ;;  %s231_s11 = sshll.u32 %s1435_s10, 4  ;;  %s1530_s11 = int_to_ptr.vmem [resolvable:$true] %s231_s11 }
   0xe   : > { %s1542_s13 = sadd.s32 1, %s1433_s27   ;;  %s31_s14 = sadd.s32 1, %s1429_s26 }
   0xf   : > { %s1931_s9 = scalar_select %p1526_p8, 1, 0 }
  0x10   : > { %p1242_p9 = pneg %p1526_p8  ;;  %s28_s15 = ssub.s32 %s1433_s27, %s1542_s13 }
  0x11   : > { %s1305_s18 = scalar_lea.hbm %s1923_s5, 8192 }
  0x12   : > { %p1537_p11 = pnand %p1242_p9, %p1926_p1  ;;  %p1306_p12 = scmp.ne.s32.totalorder %s1923_s5, %s1305_s18 }
  0x13   : > { %p1312_p5 = scmp.lt.u32.totalorder %s1305_s18, %s1923_s5 }
  0x14   : > { %p1307_p13 = pneg %p1537_p11 }
  0x16   : > { %p1308_p0 = pnand %p1307_p13, %p1306_p12 }
  0x18   : > { %p1309_p3 = pneg %p1308_p0 }
  0x1a   : > { %p1314_p7 = pnand %p1312_p5, %p1309_p3 }
  0x1c   : > { %1317 = shalt.err (!%p1314_p7)
}
  0x1d   : > { %s1318_s23 = scalar_lea.vmem %s1530_s11, 8192  ;;  %p1326_p2 = scmp.lt.s32.totalorder %s1530_s11, %s1530_s11 }
  0x1e   : > { %p1319_p9 = scmp.ne.s32.totalorder %s1530_s11, %s1318_s23  ;;  %p1327_p6 = scmp.lt.s32.totalorder %s1318_s23, %s1318_s23 }
  0x20   : > { %p1321_p10 = pnand %p1319_p9, %p1307_p13  ;;  %p1328_p4 = por %p1327_p6, %p1326_p2 }
  0x22   : > { %p1322_p1 = pneg %p1321_p10 }
  0x24   : > { %p1329_p8 = pnand %p1328_p4, %p1322_p1 }
  0x26   : > { %1332 = shalt.err (!%p1329_p8)
}
  0x27   : > { %s1436_s29 = smov 256   ;;  %s1437_s10 = smov 16  }
  0x28   : > { %1245 = dma.hbm_to_vmem [thread:$0]  (!%p1537_p11), %s1923_s5, 8192, %s1530_s11, [#allocation6], %s1436_s29, %s1436_s29, %s1437_s10  }
  0x29   : > { %p29_p2 = scmp.eq.s32.totalorder %s28_s15, 0  ;;  %p38_p1 = scmp.ne.s32.totalorder %s1429_s26, %s1425_s25 }
  0x2a   : > { %p39_p4 = scmp.eq.s32.totalorder %s1433_s27, 0  ;;  %p1255_p6 = scmp.lt.s32.totalorder %s1433_s27, 2 }
  0x2b   : > { %s1573_s18 = scalar_select %p29_p2, %s1429_s26, %s31_s14  }
  0x2c   : > { %p40_p8 = por %p39_p4, %p38_p1  ;;  %p1933_p10 = scmp.eq.s32.totalorder %s1507_s28, 1 }
  0x2d   : > { %s248_s20 = sand.u32 1, %s1429_s26   ;;  %s1053_s21 = sshll.u32 %s1433_s27, 8 }
  0x2e   : > { %p1577_p12 = por %p1933_p10, %p38_p1  ;;  %s1039_s22 = sshll.u32 %s248_s20, 4 }
  0x2f   : > { %s1586_s16 = scalar_lea.hbm %s1918_s0, %s1053_s21  ;;  %s252_s11 = scalar_lea.vmem [#allocation2], %s1039_s22 }
  0x30   : > { %s259_s14 = sshll.u32 %s252_s11, 4  ;;  %p1588_p11 = pnand %p1255_p6, %p40_p8  ;;  %s1592_s14 = int_to_ptr.vmem [resolvable:$true] %s259_s14 }
  0x31   : > { %s1594_s29 = scalar_lea.sflag [#allocation3], %s248_s20  ;;  %s1333_s10 = scalar_lea.hbm %s1586_s16, 256 }
  0x32   : > { %p1334_p13 = scmp.ne.s32.totalorder %s1586_s16, %s1333_s10  ;;  %p1335_p0 = pneg %p1588_p11 }
  0x33   : > { %s1338_s22 = scalar_lea.hbm %s1918_s0, 512  ;;  %p1339_p7 = scmp.lt.u32.totalorder %s1586_s16, %s1918_s0 }
  0x34   : > { %p1336_p3 = pnand %p1335_p0, %p1334_p13  ;;  %p1340_p9 = scmp.lt.u32.totalorder %s1338_s22, %s1333_s10 }
  0x35   : > { %p1342_p1 = scmp.lt.u32.totalorder %s1333_s10, %s1586_s16 }
  0x36   : > { %p1337_p5 = pneg %p1336_p3  ;;  %p1341_p2 = por %p1340_p9, %p1339_p7 }
  0x38   : > { %p1343_p4 = por %p1342_p1, %p1341_p2 }
  0x3a   : > { %p1344_p6 = pnand %p1343_p4, %p1337_p5 }
  0x3c   : > { %1347 = shalt.err (!%p1344_p6)
}
  0x3d   : > { %s1348_s20 = scalar_lea.vmem %s1592_s14, 256  ;;  %s1438_s11 = smov [#allocation2]  }
  0x3e   : > { %p1349_p8 = scmp.ne.s32.totalorder %s1592_s14, %s1348_s20  ;;  %s1353_s17 = sshll.u32 %s1438_s11, 4  ;;  %s1354_s17 = int_to_ptr.vmem [resolvable:$false] %s1353_s17 }
  0x3f   : > { %s1355_s21 = scalar_lea.vmem %s1354_s17, 512  ;;  %p1356_p3 = scmp.lt.s32.totalorder %s1592_s14, %s1354_s17 }
  0x40   : > { %p1351_p10 = pnand %p1349_p8, %p1335_p0  ;;  %p1357_p7 = scmp.lt.s32.totalorder %s1355_s21, %s1348_s20 }
  0x42   : > { %p1352_p13 = pneg %p1351_p10  ;;  %p1358_p9 = por %p1357_p7, %p1356_p3 }
  0x44   : > { %p1359_p2 = pnand %p1358_p9, %p1352_p13 }
  0x46   : > { %1362 = shalt.err (!%p1359_p2)
}
  0x47   : > { %s1439_s10 = smov 128   ;;  %s1440_s22 = smov 8  }
  0x48   : > { %1249 = dma.hbm_to_vmem [thread:$0]  (!%p1588_p11), %s1586_s16, 256, %s1592_s14, %s1594_s29, %s1439_s10, %s1439_s10, %s1440_s22  }
  0x49   : > { %p1936_p0 = scmp.ne.s32.totalorder %s1931_s9, 0 }
  0x4a   : > { %s1625_s12 = sand.u32 (!%p1936_p0), 1, %s1425_s25   ;;  %p1937_p5 = scmp.ne.s32.totalorder (!%p1936_p0), %s1929_s30, 0 }
  0x4b   : > { %271 = sbr.rel (%p1936_p0) target bundleno = 1197 (0x4ad), region = 48  ;;  %s1043_s23 = sshll.u32 (!%p1936_p0), %s1625_s12, 4 }
  0x4c   : > { %s274_s20 = scalar_lea.sflag (!%p1936_p0), [#allocation3], %s1625_s12  ;;  %s1629_s11 = scalar_lea.vmem (!%p1936_p0), [#allocation2], %s1043_s23 }
  0x52   : > { %1408 = dma.done.wait (%p1937_p5), %s274_s20, 256  }
  0x53   : > { %1410 = vsyncadd (%p1937_p5), %s274_s20, 4294967040  ;;  %p1938_p11 = scmp.eq.s32.totalorder %s1507_s28, 0 }
  0x55   : > { %1412 = dma.done.wait (%p1938_p11), [#allocation6], 8192   ;;  %p1939_p1 = pmov %p1938_p11 }
  0x56   : > { %v1441_v0 = vmov 0.0   ;;  %v315_v1 = vld [vmem:[%s1919_s1 + $0x8] sm:$0xff]  ;;  %v317_v2 = vld [vmem:[%s1919_s1 + $0x18] sm:$0xff]  ;;  %v314_v3 = vld [vmem:[%s1919_s1] sm:$0xff]  ;;  %vm1443_vm0 = vmmov 0   ;;  %vm553_vm1 = vcmask 15360  }
  0x57   : > { %1414 = vsyncadd (%p1939_p1), [#allocation6], 4294959104  ;;  %422 = vmatprep.mubr.f32.mxu0 %v1441_v0  ;;  %v1103_v4 = vpack.c.bf16 %v317_v2, %v315_v1  ;;  %v316_v5 = vld [vmem:[%s1919_s1 + $0x10] sm:$0xff]  ;;  %v319_v6 = vld [vmem:[%s1919_s1 + $0x28] sm:$0xff]  ;;  %vm613_vm2 = vcmask 130048   ;;  %s1045_s30 = sshll.u32 %s1625_s12, 1 }
  0x58   : > { %v321_v7 = vld [vmem:[%s1919_s1 + $0x38] sm:$0xff]  ;;  %v1105_v8 = vpack.c.bf16 %v316_v5, %v314_v3  ;;  %v318_v10 = vld [vmem:[%s1919_s1 + $0x20] sm:$0xff]  ;;  %v320_v11 = vld [vmem:[%s1919_s1 + $0x30] sm:$0xff]  ;;  %s1054_s10 = sshll.u32 %s1507_s28, 5  ;;  %s311_s22 = scalar_lea.vmem [#allocation7], %s1045_s30 }
  0x59   : > { %v1107_v9 = vpack.c.bf16 %v321_v7, %v319_v6  ;;  %v323_v12 = vld [vmem:[%s1919_s1 + $0x48] sm:$0xff]  ;;  %1104 = vmatprep.subr.bf16.mxu0 %v1103_v4  ;;  %v325_v13 = vld [vmem:[%s1919_s1 + $0x58] sm:$0xff]  ;;  %v1109_v14 = vpack.c.bf16 %v320_v11, %v318_v10  ;;  %v322_v16 = vld [vmem:[%s1919_s1 + $0x40] sm:$0xff]  ;;  %s1874_s9 = scalar_lea.hbm %s1925_s7, %s1054_s10  ;;  %s941_s16 = scalar_lea.sflag [#allocation4], %s1625_s12 }
  0x5a   : > { %1106 = vmatpush1.bf16.msra.mxu0 %v1105_v8  ;;  %v1111_v15 = vpack.c.bf16 %v325_v13, %v323_v12  ;;  %v324_v17 = vld [vmem:[%s1919_s1 + $0x50] sm:$0xff]  ;;  %v327_v18 = vld [vmem:[%s1919_s1 + $0x68] sm:$0xff]  ;;  %v329_v19 = vld [vmem:[%s1919_s1 + $0x78] sm:$0xff]  ;;  %s1445_s14 = smov [#allocation7]  }
  0x5b   : > { %1108 = vmatprep.subr.bf16.mxu0 %v1107_v9  ;;  %v1113_v20 = vpack.c.bf16 %v324_v17, %v322_v16  ;;  %v1115_v21 = vpack.c.bf16 %v329_v19, %v327_v18  ;;  %v326_v22 = vld [vmem:[%s1919_s1 + $0x60] sm:$0xff]  ;;  %v328_v23 = vld [vmem:[%s1919_s1 + $0x70] sm:$0xff]  ;;  %v331_v24 = vld [vmem:[%s1919_s1 + $0x88] sm:$0xff]  ;;  %s1367_s15 = sshll.u32 %s1445_s14, 4  ;;  %s1368_s15 = int_to_ptr.vmem [resolvable:$false] %s1367_s15 }
  0x5c   : > { %v333_v25 = vld [vmem:[%s1919_s1 + $0x98] sm:$0xff]  ;;  %v1695_v26 = vld [vmem:[%s1629_s11] sm:$0xff]  ;;  %v456_v31 = vld [vmem:[%s1921_s3 + $0x88] sm:$0xff]  ;;  %v1117_v32 = vpack.c.bf16 %v328_v23, %v326_v22  ;;  %s1369_s29 = scalar_lea.vmem %s1368_s15, 64 }
  0x5d   : > { %v330_v27 = vld [vmem:[%s1919_s1 + $0x80] sm:$0xff]  ;;  %v332_v28 = vld [vmem:[%s1919_s1 + $0x90] sm:$0xff]  ;;  %v1704_v29 = vld [vmem:[%s1629_s11 + $0x8] sm:$0xff]  ;;  %v1119_v39 = vpack.c.bf16 %v333_v25, %v331_v24  ;;  %s955_s11 = sshll.u32 %s311_s22, 4  ;;  %s1876_s11 = int_to_ptr.vmem [resolvable:$true] %s955_s11 }
  0x5e   : > { %1110 = vmatpush1.bf16.msra.mxu0 %v1109_v14  ;;  %v455_v30 = vld [vmem:[%s1921_s3 + $0x80] sm:$0xff]  ;;  %v335_v33 = vld [vmem:[%s1919_s1 + $0xa8] sm:$0xff]  ;;  %v1168_v34 = vpack.c.bf16 %v1704_v29, %v1695_v26  ;;  %v457_v38 = vld [vmem:[%s1921_s3 + $0x90] sm:$0xff]  ;;  %v1121_v49 = vpack.c.bf16 %v332_v28, %v330_v27  ;;  %s1363_s28 = scalar_lea.vmem %s1876_s11, 32  ;;  %p1370_p10 = scmp.lt.s32.totalorder %s1876_s11, %s1368_s15 }
  0x5f   : > { %1112 = vmatprep.subr.bf16.mxu0 %v1111_v15  ;;  %v1135_v35 = vpack.c.bf16 %v456_v31, %v455_v30  ;;  %v439_v36 = vld [vmem:[%s1921_s3] sm:$0xff]  ;;  %v440_v37 = vld [vmem:[%s1921_s3 + $0x8] sm:$0xff]  ;;  %v458_v41 = vld [vmem:[%s1921_s3 + $0x98] sm:$0xff]  ;;  %p1364_p4 = scmp.ne.s32.totalorder %s1876_s11, %s1363_s28  ;;  %p1371_p13 = scmp.lt.s32.totalorder %s1369_s29, %s1363_s28 }
  0x60   : > { %v1137_v40 = vpack.c.bf16 %v440_v37, %v439_v36  ;;  %v441_v42 = vld [vmem:[%s1921_s3 + $0x10] sm:$0xff]  ;;  %v442_v43 = vld [vmem:[%s1921_s3 + $0x18] sm:$0xff]  ;;  %v1139_v45 = vpack.c.bf16 %v458_v41, %v457_v38  ;;  %v459_v46 = vld [vmem:[%s1921_s3 + $0xa0] sm:$0xff] }
  0x61   : > { %v337_v44 = vld [vmem:[%s1919_s1 + $0xb8] sm:$0xff]  ;;  %1136 = vmatprep.subr.bf16.mxu1 %v1135_v35  ;;  %v460_v47 = vld [vmem:[%s1921_s3 + $0xa8] sm:$0xff]  ;;  %v1141_v48 = vpack.c.bf16 %v442_v43, %v441_v42  ;;  %v334_v50 = vld [vmem:[%s1919_s1 + $0xa0] sm:$0xff]  ;;  %p1365_p6 = pnand %p1364_p4, %p1577_p12  ;;  %p1372_p3 = por %p1371_p13, %p1370_p10 }
  0x62   : > { %1114 = vmatpush1.bf16.msra.mxu0 %v1113_v20  ;;  %1138 = vmatpush3.bf16.msra.mxu1 %v1137_v40  ;;  %v1143_v51 = vpack.c.bf16 %v460_v47, %v459_v46  ;;  %v443_v52 = vld [vmem:[%s1921_s3 + $0x20] sm:$0xff]  ;;  %v444_v53 = vld [vmem:[%s1921_s3 + $0x28] sm:$0xff]  ;;  %v1123_v54 = vpack.c.bf16 %v337_v44, %v335_v33  ;;  %v336_v55 = vld [vmem:[%s1919_s1 + $0xb0] sm:$0xff]  ;;  %v348_v40 = vlaneseq }
  0x63   : > { %1116 = vmatprep.subr.bf16.mxu0 %v1115_v21  ;;  %1140 = vmatprep.subr.bf16.mxu1 %v1139_v45  ;;  %v461_v56 = vld [vmem:[%s1921_s3 + $0xb0] sm:$0xff]  ;;  %v462_v57 = vld [vmem:[%s1921_s3 + $0xb8] sm:$0xff]  ;;  %v339_v58 = vld [vmem:[%s1919_s1 + $0xc8] sm:$0xff]  ;;  %v1145_v60 = vpack.c.bf16 %v444_v53, %v443_v52  ;;  %v1125_v61 = vpack.c.bf16 %v336_v55, %v334_v50  ;;  %p1366_p8 = pneg %p1365_p6 }
  0x64   : > { %v341_v59 = vld [vmem:[%s1919_s1 + $0xd8] sm:$0xff]  ;;  %v338_v62 = vld [vmem:[%s1919_s1 + $0xc0] sm:$0xff]  ;;  %v1147_v63 = vpack.c.bf16 %v462_v57, %v461_v56  ;;  %v445_v1 = vld [vmem:[%s1921_s3 + $0x30] sm:$0xff]  ;;  %v1844_v41 = vshrl.u32 %v348_v40, 7  ;;  %vm937_vm3 = vcmp.lt.s32.totalorder %v348_v40, 256 }
  0x65   : > { %v446_v2 = vld [vmem:[%s1921_s3 + $0x38] sm:$0xff]  ;;  %v1127_v3 = vpack.c.bf16 %v341_v59, %v339_v58  ;;  %v340_v4 = vld [vmem:[%s1919_s1 + $0xd0] sm:$0xff]  ;;  %v463_v5 = vld [vmem:[%s1921_s3 + $0xc0] sm:$0xff]  ;;  %v1442_v59 = vmov 0.0|0.0   ;;  %p1373_p7 = pnand %p1372_p3, %p1366_p8 }
  0x66   : > { %1118 = vmatpush1.bf16.msra.mxu0 %v1117_v32  ;;  %1142 = vmatpush3.bf16.msra.mxu1 %v1141_v48  ;;  %v464_v6 = vld [vmem:[%s1921_s3 + $0xc8] sm:$0xff]  ;;  %v345_v8 = vld [vmem:[%s1919_s1 + $0xf8] sm:$0xff]  ;;  %v1149_v9 = vpack.c.bf16 %v446_v2, %v445_v1  ;;  %v1129_v10 = vpack.c.bf16 %v340_v4, %v338_v62  ;;  %v342_v11 = vld [vmem:[%s1919_s1 + $0xe0] sm:$0xff]  ;;  %v350_v42 = vsub.s32 0, %v1844_v41  ;;  %v354_v44 = vsub.s32 1, %v1844_v41 }
  0x67   : > { %1120 = vmatprep.subr.bf16.mxu0 %v1119_v39  ;;  %1144 = vmatprep.subr.bf16.mxu1 %v1143_v51  ;;  %v343_v7 = vld [vmem:[%s1919_s1 + $0xe8] sm:$0xff]  ;;  %v1151_v12 = vpack.c.bf16 %v464_v6, %v463_v5  ;;  %v447_v13 = vld [vmem:[%s1921_s3 + $0x40] sm:$0xff]  ;;  %v344_v16 = vld [vmem:[%s1919_s1 + $0xf0] sm:$0xff] }
  0x68   : > { %v448_v14 = vld [vmem:[%s1921_s3 + $0x48] sm:$0xff]  ;;  %v1131_v15 = vpack.c.bf16 %v345_v8, %v343_v7  ;;  %v465_v17 = vld [vmem:[%s1921_s3 + $0xd0] sm:$0xff]  ;;  %v466_v18 = vld [vmem:[%s1921_s3 + $0xd8] sm:$0xff]  ;;  %v1133_v20 = vpack.c.bf16 %v344_v16, %v342_v11 }
  0x69   : > { %v1153_v19 = vpack.c.bf16 %v448_v14, %v447_v13  ;;  %v1155_v21 = vpack.c.bf16 %v466_v18, %v465_v17  ;;  %v449_v22 = vld [vmem:[%s1921_s3 + $0x50] sm:$0xff]  ;;  %v450_v23 = vld [vmem:[%s1921_s3 + $0x58] sm:$0xff]  ;;  %v467_v24 = vld [vmem:[%s1921_s3 + $0xe0] sm:$0xff] }
  0x6a   : > { %1122 = vmatpush1.bf16.msra.mxu0 %v1121_v49  ;;  %1146 = vmatpush3.bf16.msra.mxu1 %v1145_v60  ;;  %v468_v25 = vld [vmem:[%s1921_s3 + $0xe8] sm:$0xff]  ;;  %v1157_v27 = vpack.c.bf16 %v450_v23, %v449_v22  ;;  %v451_v30 = vld [vmem:[%s1921_s3 + $0x60] sm:$0xff]  ;;  %v469_v33 = vld [vmem:[%s1921_s3 + $0xf0] sm:$0xff] }
  0x6b   : > { %1124 = vmatprep.subr.bf16.mxu0 %v1123_v54  ;;  %1148 = vmatprep.subr.bf16.mxu1 %v1147_v63  ;;  %v1159_v28 = vpack.c.bf16 %v468_v25, %v467_v24  ;;  %v452_v31 = vld [vmem:[%s1921_s3 + $0x68] sm:$0xff]  ;;  %v470_v35 = vld [vmem:[%s1921_s3 + $0xf8] sm:$0xff]  ;;  %v453_v37 = vld [vmem:[%s1921_s3 + $0x70] sm:$0xff] }
  0x6c   : > { %v1161_v32 = vpack.c.bf16 %v452_v31, %v451_v30  ;;  %v1163_v36 = vpack.c.bf16 %v470_v35, %v469_v33  ;;  %v454_v38 = vld [vmem:[%s1921_s3 + $0x78] sm:$0xff]  ;;  %v346_v43 = vld [vmem:[%s1920_s2] sm:$0x3] }
  0x6d   : > { %v1165_v39 = vpack.c.bf16 %v454_v38, %v453_v37  ;;  %v351_v45 = vrot.slane %v346_v43, %v350_v42  ;;  %v355_v46 = vrot.slane %v346_v43, %v354_v44  ;;  %v1046_v63 = vld [vmem:[%s1922_s4] ss:$0 sm:$0xff]  ;;  %v691_v33 = vld [vmem:[#allocation5 + $0x18] sm:$0xff]  ;;  %v690_v37 = vld [vmem:[#allocation5 + $0x10] sm:$0xff] }
  0x6e   : > { %1126 = vmatpush1.bf16.msra.mxu0 %v1125_v61  ;;  %1150 = vmatpush3.bf16.msra.mxu1 %v1149_v9  ;;  %v688_v35 = vld [vmem:[#allocation5] sm:$0xff]  ;;  %v811_v38 = vld [vmem:[#allocation5 + $0x108] sm:$0xff] }
  0x6f   : > { %1128 = vmatprep.subr.bf16.mxu0 %v1127_v3  ;;  %1152 = vmatprep.subr.bf16.mxu1 %v1151_v12  ;;  %v1172_v42 = vpack.c.bf16 %v690_v37, %v688_v35  ;;  %v693_v44 = vld [vmem:[#allocation5 + $0x28] sm:$0xff]  ;;  %v820_v37 = vld [vmem:[#allocation5 + $0x150] sm:$0xff] }
  0x72   : > { %1130 = vmatpush1.bf16.msra.mxu0 %v1129_v10  ;;  %1154 = vmatpush3.bf16.msra.mxu1 %v1153_v19 }
  0x73   : > { %1132 = vmatprep.subr.bf16.mxu0 %v1131_v15  ;;  %1156 = vmatprep.subr.bf16.mxu1 %v1155_v21 }
  0x76   : > { %1134 = vmatpush1.bf16.msra.mxu0 %v1133_v20  ;;  %1158 = vmatpush3.bf16.msra.mxu1 %v1157_v27 }
  0x77   : > { %1160 = vmatprep.subr.bf16.mxu1 %v1159_v28  ;;  %1167 = vmatprep.subr.bf16.mxu0 %v1442_v59 }
  0x79   : > { %423 = vmatmul.mubr.f32.vlgmr.msra.gmra.mrb[0].mxu0 %v1695_v26 }
  0x7a   : > { %428 = vmatprep.mubr.f32.mxu0 %v1441_v0  ;;  %1162 = vmatpush3.bf16.msra.mxu1 %v1161_v32  ;;  %v689_v32 = vld [vmem:[#allocation5 + $0x8] sm:$0xff] }
  0x7b   : > { %1164 = vmatprep.subr.bf16.mxu1 %v1163_v36  ;;  %1169 = vmatpush3.bf16.msra.mxu0 %v1168_v34  ;;  %v1170_v36 = vpack.c.bf16 %v691_v33, %v689_v32  ;;  %v821_v32 = vld [vmem:[#allocation5 + $0x158] sm:$0xff] }
  0x7d   : > { %429 = vmatmul.mubr.f32.gmra.mrb[2].mxu0 %v1704_v29 }
  0x7e   : > { %1166 = vmatpush3.bf16.msra.mxu1 %v1165_v39  ;;  %1100 = vmatprep.mubr.msk.f32.mxu0 %vm1443_vm0, %v1441_v0  ;;  %v813_v39 = vld [vmem:[#allocation5 + $0x118] sm:$0xff] }
  0x7f   : > { %v1202_v43 = vpack.c.bf16 %v813_v39, %v811_v38  ;;  %1171 = vmatprep.subr.bf16.mxu1 %v1170_v36  ;;  %v818_v36 = vld [vmem:[#allocation5 + $0x140] sm:$0xff]  ;;  %v823_v38 = vld [vmem:[#allocation5 + $0x168] sm:$0xff]  ;;  %v825_v39 = vld [vmem:[#allocation5 + $0x178] sm:$0xff] }
  0x81   : > { %1203 = vmatprep.subr.bf16.mxu0 %v1202_v43  ;;  %v1214_v43 = vpack.c.bf16 %v825_v39, %v823_v38 }
 0x14c   : > { %v424_v47 = vpop.f32.mrb[0].mxu0 }
 0x14d   : > { %v425_v48 = vadd.f32 %v424_v47, %v351_v45  ;;  %v426_v49 = vpop.f32.mrb[1].mxu0  ;;  %v694_v47 = vld [vmem:[#allocation5 + $0x30] sm:$0xff] }
 0x14e   : > { %v427_v50 = vadd.f32 %v426_v49, %v355_v46 }
 0x14f   : > { %v435_v53 = vmax.f32 %v425_v48, 0.0 }
 0x150   : > { %v430_v51 = vpop.f32.mrb[2].mxu0  ;;  %v436_v52 = vmax.f32 %v427_v50, 0.0  ;;  %v697_v50 = vld [vmem:[#allocation5 + $0x48] sm:$0xff] }
 0x151   : > { %v431_v54 = vadd.f32 %v430_v51, %v351_v45  ;;  %v432_v55 = vpop.f32.mrb[3].mxu0  ;;  %v695_v45 = vld [vmem:[#allocation5 + $0x38] sm:$0xff] }
 0x152   : > { %v433_v56 = vadd.f32 %v432_v55, %v355_v46  ;;  %542 = vmatprep.mubr.f32.mxu1 %v436_v52  ;;  %v692_v46 = vld [vmem:[#allocation5 + $0x20] sm:$0xff]  ;;  %v1174_v48 = vpack.c.bf16 %v695_v45, %v693_v44  ;;  %v699_v51 = vld [vmem:[#allocation5 + $0x58] sm:$0xff]  ;;  %v824_v45 = vld [vmem:[#allocation5 + $0x170] sm:$0xff] }
 0x153   : > { %543 = vmatmul.mubr.f32.vlgmr.msra.gmra.mrb[0].mxu1 %v435_v53  ;;  %v437_v58 = vmax.f32 %v431_v54, 0.0  ;;  %v1176_v49 = vpack.c.bf16 %v694_v47, %v692_v46  ;;  %v1178_v52 = vpack.c.bf16 %v699_v51, %v697_v50  ;;  %v696_v53 = vld [vmem:[#allocation5 + $0x40] sm:$0xff]  ;;  %v698_v54 = vld [vmem:[#allocation5 + $0x50] sm:$0xff]  ;;  %v827_v46 = vld [vmem:[#allocation5 + $0x188] sm:$0xff] }
 0x154   : > { %v438_v57 = vmax.f32 %v433_v56, 0.0  ;;  %1173 = vmatpush1.bf16.msra.mxu1 %v1172_v42  ;;  %v1180_v55 = vpack.c.bf16 %v698_v54, %v696_v53  ;;  %v701_v56 = vld [vmem:[#allocation5 + $0x68] sm:$0xff]  ;;  %v1212_v42 = vpack.c.bf16 %v820_v37, %v818_v36  ;;  %v822_v44 = vld [vmem:[#allocation5 + $0x160] sm:$0xff]  ;;  %v829_v47 = vld [vmem:[#allocation5 + $0x198] sm:$0xff] }
 0x155   : > { %1175 = vmatprep.subr.bf16.mxu1 %v1174_v48  ;;  %v1216_v48 = vpack.c.bf16 %v824_v45, %v822_v44  ;;  %v826_v50 = vld [vmem:[#allocation5 + $0x180] sm:$0xff]  ;;  %v831_v51 = vld [vmem:[#allocation5 + $0x1a8] sm:$0xff] }
 0x156   : > { %547 = vmatprep.mubr.f32.mxu1 %v438_v57  ;;  %v703_v57 = vld [vmem:[#allocation5 + $0x78] sm:$0xff] }
 0x157   : > { %548 = vmatmul.mubr.f32.gmra.mrb[2].mxu1 %v437_v58  ;;  %v700_v58 = vld [vmem:[#allocation5 + $0x60] sm:$0xff]  ;;  %v1182_v59 = vpack.c.bf16 %v703_v57, %v701_v56  ;;  %v832_v56 = vld [vmem:[#allocation5 + $0x1b0] sm:$0xff]  ;;  %v835_v57 = vld [vmem:[#allocation5 + $0x1c8] sm:$0xff] }
 0x158   : > { %784 = vmatprep.mubr.f32.mxu1 %v1441_v0  ;;  %1177 = vmatpush1.bf16.msra.mxu1 %v1176_v49  ;;  %v1218_v49 = vpack.c.bf16 %v829_v47, %v827_v46 }
 0x159   : > { %1179 = vmatprep.subr.bf16.mxu1 %v1178_v52  ;;  %v833_v52 = vld [vmem:[#allocation5 + $0x1b8] sm:$0xff] }
 0x15a   : > { %v1222_v54 = vpack.c.bf16 %v833_v52, %v831_v51 }
 0x15c   : > { %1181 = vmatpush1.bf16.msra.mxu1 %v1180_v55  ;;  %v830_v55 = vld [vmem:[#allocation5 + $0x1a0] sm:$0xff] }
 0x15d   : > { %1183 = vmatprep.subr.bf16.mxu1 %v1182_v59  ;;  %v1224_v59 = vpack.c.bf16 %v832_v56, %v830_v55 }
 0x226   : > { %v1087_v60 = vpop.f32.mrb[0].mxu1 }
 0x227   : > { %v1088_v61 = vpop.f32.mrb[1].mxu1 }
 0x228   : > { %v1089_v62 = vadd.f32 %v1088_v61, %v1087_v60  ;;  %v702_v60 = vld [vmem:[#allocation5 + $0x70] sm:$0xff] }
 0x229   : > { %v1184_v61 = vpack.c.bf16 %v702_v60, %v700_v58  ;;  %v837_v58 = vld [vmem:[#allocation5 + $0x1d8] sm:$0xff] }
 0x22a   : > { %v1090_v1 = vpop.f32.mrb[2].mxu1  ;;  %v545_v3 = vadd.f32 %v1089_v62, %v1046_v63  ;;  %v705_v62 = vld [vmem:[#allocation5 + $0x88] sm:$0xff]  ;;  %v1226_v60 = vpack.c.bf16 %v837_v58, %v835_v57 }
 0x22b   : > { %v1091_v2 = vpop.f32.mrb[3].mxu1  ;;  %1185 = vmatpush1.bf16.msra.mxu1 %v1184_v61  ;;  %v834_v61 = vld [vmem:[#allocation5 + $0x1c0] sm:$0xff] }
 0x22c   : > { %v1092_v4 = vadd.f32 %v1091_v2, %v1090_v1  ;;  %v554_v6 = vsel %vm553_vm1, %v545_v3, -inf  ;;  %v704_v1 = vld [vmem:[#allocation5 + $0x80] sm:$0xff] }
 0x22e   : > { %v550_v5 = vadd.f32 %v1092_v4, %v1046_v63  ;;  %v707_v63 = vld [vmem:[#allocation5 + $0x98] sm:$0xff] }
 0x22f   : > { %v1186_v2 = vpack.c.bf16 %v707_v63, %v705_v62  ;;  %v836_v62 = vld [vmem:[#allocation5 + $0x1d0] sm:$0xff]  ;;  %v839_v63 = vld [vmem:[#allocation5 + $0x1e8] sm:$0xff] }
 0x230   : > { %v555_v7 = vsel %vm553_vm1, %v550_v5, -inf }
 0x231   : > { %v556_v8 = vmax.f32 %v554_v6, %v555_v7  ;;  %1187 = vmatprep.subr.bf16.mxu1 %v1186_v2  ;;  %v711_v6 = vld [vmem:[#allocation5 + $0xb8] sm:$0xff]  ;;  %v708_v7 = vld [vmem:[#allocation5 + $0xa0] sm:$0xff]  ;;  %v1228_v2 = vpack.c.bf16 %v836_v62, %v834_v61 }
 0x233   : > { %v557_v26 = vrot.slane %v556_v8, 4 }
 0x235   : > { %v558_v29 = vmax.f32 %v556_v8, %v557_v26  ;;  %v710_v26 = vld [vmem:[#allocation5 + $0xb0] sm:$0xff] }
 0x237   : > { %v559_v34 = vrot.slane %v558_v29, 2 }
 0x239   : > { %v560_v9 = vmax.f32 %v558_v29, %v559_v34  ;;  %v1192_v29 = vpack.c.bf16 %v710_v26, %v708_v7  ;;  %v713_v34 = vld [vmem:[#allocation5 + $0xc8] sm:$0xff] }
 0x23b   : > { %v561_v10 = vrot.slane %v560_v9, 1 }
 0x23d   : > { %v562_v11 = vmax.f32 %v560_v9, %v561_v10  ;;  %v715_v9 = vld [vmem:[#allocation5 + $0xd8] sm:$0xff]  ;;  %v712_v10 = vld [vmem:[#allocation5 + $0xc0] sm:$0xff] }
 0x23f   : > { %v563_v12 = vsub.f32 %v545_v3, %v562_v11  ;;  %v564_v13 = vsub.f32 %v550_v5, %v562_v11  ;;  %v706_v3 = vld [vmem:[#allocation5 + $0x90] sm:$0xff]  ;;  %v709_v5 = vld [vmem:[#allocation5 + $0xa8] sm:$0xff]  ;;  %v1194_v11 = vpack.c.bf16 %v715_v9, %v713_v34 }
 0x240   : > { %v1188_v4 = vpack.c.bf16 %v706_v3, %v704_v1  ;;  %v1190_v8 = vpack.c.bf16 %v711_v6, %v709_v5  ;;  %v841_v1 = vld [vmem:[#allocation5 + $0x1f8] sm:$0xff]  ;;  %v840_v5 = vld [vmem:[#allocation5 + $0x1f0] sm:$0xff] }
 0x241   : > { %v565_v14 = vmul.f32 1.442695, %v563_v12  ;;  %v567_v15 = vmul.f32 1.442695, %v564_v13  ;;  %v714_v12 = vld [vmem:[#allocation5 + $0xd0] sm:$0xff]  ;;  %v1230_v3 = vpack.c.bf16 %v841_v1, %v839_v63 }
 0x242   : > { %1189 = vmatpush1.bf16.msra.mxu1 %v1188_v4  ;;  %v1196_v13 = vpack.c.bf16 %v714_v12, %v712_v10  ;;  %v838_v4 = vld [vmem:[#allocation5 + $0x1e0] sm:$0xff] }
 0x243   : > { %1299 = vpow2.f32 %v565_v14  ;;  %1191 = vmatprep.subr.bf16.mxu1 %v1190_v8  ;;  %v717_v14 = vld [vmem:[#allocation5 + $0xe8] sm:$0xff]  ;;  %v1232_v6 = vpack.c.bf16 %v840_v5, %v838_v4 }
 0x244   : > { %1301 = vpow2.f32 %v567_v15  ;;  %v719_v15 = vld [vmem:[#allocation5 + $0xf8] sm:$0xff] }
 0x246   : > { %1193 = vmatpush1.bf16.msra.mxu1 %v1192_v29  ;;  %v1444_v29 = vmov 1966171168  }
 0x247   : > { %1195 = vmatprep.subr.bf16.mxu1 %v1194_v11  ;;  %v795_v34 = vunpack.c.l.s4 %v1444_v29 }
 0x249   : > { %v796_v9 = vunpack.c.0.s8 %v795_v34 }
 0x24a   : > { %1197 = vmatpush1.bf16.msra.mxu1 %v1196_v13 }
 0x24b   : > { %v799_v11 = vsub.s32 %v796_v9, %v1844_v41 }
 0x24d   : > { %v1300_v16 = vpop.eup %1299 }
 0x24e   : > { %v1302_v17 = vpop.eup %1301  ;;  %v569_v18 = vsel %vm553_vm1, %v1300_v16, 0.0 }
 0x24f   : > { %v570_v19 = vsel %vm553_vm1, %v1302_v17, 0.0 }
 0x250   : > { %v571_v20 = vadd.f32 %v570_v19, %v569_v18  ;;  %v718_v18 = vld [vmem:[#allocation5 + $0xf0] sm:$0xff] }
 0x252   : > { %v572_v21 = vrot.slane %v571_v20, 4 }
 0x254   : > { %v573_v22 = vadd.f32 %v572_v21, %v571_v20  ;;  %v810_v20 = vld [vmem:[#allocation5 + $0x100] sm:$0xff]  ;;  %v812_v21 = vld [vmem:[#allocation5 + $0x110] sm:$0xff] }
 0x256   : > { %v574_v23 = vrot.slane %v573_v22, 2 }
 0x258   : > { %v575_v24 = vadd.f32 %v574_v23, %v573_v22  ;;  %v815_v22 = vld [vmem:[#allocation5 + $0x128] sm:$0xff]  ;;  %v817_v23 = vld [vmem:[#allocation5 + $0x138] sm:$0xff] }
 0x25a   : > { %v576_v25 = vrot.slane %v575_v24, 1 }
 0x25c   : > { %v577_v27 = vadd.f32 %v576_v25, %v575_v24  ;;  %v1204_v24 = vpack.c.bf16 %v812_v21, %v810_v20  ;;  %v1206_v25 = vpack.c.bf16 %v817_v23, %v815_v22 }
 0x25e   : > { %1303 = vrcp.f32 %v577_v27  ;;  %v814_v27 = vld [vmem:[#allocation5 + $0x120] sm:$0xff] }
 0x268   : > { %v1304_v28 = vpop.eup %1303 }
 0x269   : > { %v579_v30 = vmul.f32 %v1304_v28, %v1300_v16  ;;  %v580_v31 = vmul.f32 %v1304_v28, %v1302_v17  ;;  %v716_v16 = vld [vmem:[#allocation5 + $0xe0] sm:$0xff]  ;;  %v1198_v17 = vpack.c.bf16 %v719_v15, %v717_v14  ;;  %v816_v28 = vld [vmem:[#allocation5 + $0x130] sm:$0xff] }
 0x26a   : > { %v1200_v19 = vpack.c.bf16 %v718_v18, %v716_v16  ;;  %v1208_v33 = vpack.c.bf16 %v816_v28, %v814_v27  ;;  %v687_v18 = vld [vmem:[%s1924_s6] sm:$0x3] }
 0x26b   : > { %581 = vxpose.xlu0.b32.start [1/2] (short) (narrow) %v579_v30, 8  ;;  %1199 = vmatprep.subr.bf16.mxu1 %v1198_v17 }
 0x26c   : > { %1201 = vmatpush1.bf16.msra.mxu1 %v1200_v19 }
 0x26f   : > { %582 = vxpose.xlu0.b32.end [2/2] (short) (narrow) %v580_v31, 8  ;;  %v819_v31 = vld [vmem:[#allocation5 + $0x148] sm:$0xff] }
 0x270   : > { %v1210_v35 = vpack.c.bf16 %v821_v32, %v819_v31 }
 0x2eb   : > { %v597_v30 = vpop.trf.xlu0 }
 0x2ec   : > { %1101 = vmatmul.mubr.msk.f32.vlgmr.msra.gmra.mrb[4].mxu0 %vm613_vm2, %v597_v30 }
 0x2ed   : > { %1205 = vmatpush1.bf16.msra.mxu0 %v1204_v24  ;;  %909 = vmatprep.mubr.f32.mxu0 %v1441_v0  ;;  %v828_v0 = vld [vmem:[#allocation5 + $0x190] sm:$0xff] }
 0x2ee   : > { %1207 = vmatprep.subr.bf16.mxu0 %v1206_v25  ;;  %v1220_v53 = vpack.c.bf16 %v828_v0, %v826_v50 }
 0x2f1   : > { %1209 = vmatpush1.bf16.msra.mxu0 %v1208_v33 }
 0x2f2   : > { %1211 = vmatprep.subr.bf16.mxu0 %v1210_v35 }
 0x2f5   : > { %1213 = vmatpush1.bf16.msra.mxu0 %v1212_v42 }
 0x2f6   : > { %1215 = vmatprep.subr.bf16.mxu0 %v1214_v43 }
 0x2f9   : > { %1217 = vmatpush1.bf16.msra.mxu0 %v1216_v48 }
 0x2fa   : > { %1219 = vmatprep.subr.bf16.mxu0 %v1218_v49 }
 0x2fd   : > { %1221 = vmatpush1.bf16.msra.mxu0 %v1220_v53 }
 0x2fe   : > { %1223 = vmatprep.subr.bf16.mxu0 %v1222_v54 }
 0x301   : > { %1225 = vmatpush1.bf16.msra.mxu0 %v1224_v59 }
 0x302   : > { %1227 = vmatprep.subr.bf16.mxu0 %v1226_v60 }
 0x305   : > { %1229 = vmatpush1.bf16.msra.mxu0 %v1228_v2 }
 0x306   : > { %1231 = vmatprep.subr.bf16.mxu0 %v1230_v3 }
 0x309   : > { %1233 = vmatpush1.bf16.msra.mxu0 %v1232_v6 }
 0x3bf   : > { %v683_v7 = vpop.f32.mrb[4].mxu0 }
 0x3c0   : > { %v843_v8 = vrot.slane %v683_v7, 1  ;;  %v1102_v26 = vpop.f32.mrb[5].mxu0  ;;  %785 = vmatmul.mubr.f32.vlgmr.msra.gmra.mrb[4].mxu1 %v683_v7 }
 0x3c2   : > { %910 = vmatmul.mubr.f32.vlgmr.msra.gmra.mrb[6].mxu0 %v843_v8 }
 0x493   : > { %v786_v10 = vpop.f32.mrb[4].mxu1 }
 0x494   : > { %v788_v12 = vpop.f32.mrb[5].mxu1 }
 0x495   : > { %v793_v13 = vcombine.low %v786_v10, %v788_v12  ;;  %v911_v14 = vpop.f32.mrb[6].mxu0 }
 0x496   : > { %v913_v15 = vpop.f32.mrb[7].mxu0 }
 0x497   : > { %v800_v16 = vrot.slane %v793_v13, %v799_v11  ;;  %v918_v17 = vcombine.low %v911_v14, %v913_v15 }
 0x499   : > { %v807_v19 = vrot.slane %v800_v16, %v799_v11  ;;  %v925_v20 = vrot.slane %v918_v17, %v799_v11 }
 0x49b   : > { %v809_v21 = vadd.f32 %v807_v19, %v687_v18  ;;  %v932_v41 = vrot.slane %v925_v20, %v799_v11 }
 0x49d   : > { %v934_v22 = vadd.f32 %v932_v41, %v809_v21 }
 0x49f   : > { %939 = vst.msk [vmem:[%s311_s22] sm:$0x3] %vm937_vm3, %v934_v22 }
 0x4a0   : > { %1376 = shalt.err (!%p1373_p7)
}
 0x4a1   : > { %s1377_s12 = scalar_lea.hbm %s1874_s9, 32  ;;  %s1381_s21 = scalar_lea.hbm %s1925_s7, 64 }
 0x4a2   : > { %p1378_p9 = scmp.ne.s32.totalorder %s1874_s9, %s1377_s12  ;;  %p1382_p5 = scmp.lt.u32.totalorder %s1874_s9, %s1925_s7 }
 0x4a3   : > { %p1383_p11 = scmp.lt.u32.totalorder %s1381_s21, %s1377_s12  ;;  %p1385_p4 = scmp.lt.u32.totalorder %s1377_s12, %s1874_s9 }
 0x4a4   : > { %p1379_p2 = pnand %p1378_p9, %p1577_p12 }
 0x4a5   : > { %p1384_p1 = por %p1383_p11, %p1382_p5 }
 0x4a6   : > { %p1380_p0 = pneg %p1379_p2 }
 0x4a7   : > { %p1386_p6 = por %p1385_p4, %p1384_p1 }
 0x4a9   : > { %p1387_p8 = pnand %p1386_p6, %p1380_p0 }
 0x4ab   : > { %1390 = shalt.err (!%p1387_p8)
}
 0x4ac   : > { %1240 = dma.vmem_to_hbm [thread:$0]  (%p1577_p12), %s1876_s11, 32, %s1874_s9, %s941_s16  }
 0x4ad PF: > { %s967_s23 = sand.u32 1, %s1421_s24   ;;  %p1940_p10 = scmp.ne.s32.totalorder %s1930_s8, 0 }
 0x4ae   : > { %p1941_p13 = scmp.ge.s32.totalorder %s1433_s27, 2  ;;  %s968_s20 = scalar_lea.sflag [#allocation4], %s967_s23 }
 0x4b0   : > { %p1251_p3 = pnand %p1941_p13, %p1940_p10 }
 0x4b2   : > { %1416 = dma.done.wait (!%p1251_p3), %s968_s20, 32  }
 0x4b3   : > { %1418 = vsyncadd (!%p1251_p3), %s968_s20, 4294967264  ;;  %p21_p7 = scmp.ge.s32.totalorder %s1542_s13, 4   ;;  %s1942_s24 = smov %s1425_s25 }
 0x4b4   : > { %s1943_s25 = smov %s1429_s26  ;;  %s1944_s26 = smov %s1573_s18 }
 0x4b5   : > { %s1945_s27 = smov %s1542_s13  ;;  %23 = sbr.rel (!%p21_p7) target bundleno = 6 (0x6), region = 97 }
 0x4bc   :  { %973 = vsyncpa [#allocation3], 1 }
 0x4bd   :  { %975 = vsyncpa [#allocation3 + $0x1], 1 }
 0x4be   :  { %976 = vsyncpa [#allocation6], 1 }
 0x4bf   :  { %977 = vsyncpa [#allocation4], 1 }
 0x4c0   :  { %979 = vsyncpa [#allocation4 + $0x1], 1 }

</bundles_post_ra>
